<compile_context>
chip_gen: v7x
topology: tpu7x:2x2x1
jax: 0.10.0
libtpu: 0.0.40
codegen_flags: <defaults>
</compile_context>

<pallas_src>
import math
import functools

import jax
import jax.numpy as jnp
from jax.experimental import pallas as pl
from jax.experimental.pallas import tpu as pltpu


def make_positional_encoding(max_seq_len, d_model):
    """Exactly mirrors the PyTorch buffer construction:
       pe[pos, i]   = sin(pos / 10000 ** (2 * i       / d_model))   for even i
       pe[pos, i+1] = cos(pos / 10000 ** (2 * (i + 1) / d_model))
    """
    pos = jnp.arange(max_seq_len, dtype=jnp.float32)[:, None]           # (L, 1)
    i = jnp.arange(0, d_model, 2, dtype=jnp.float32)[None, :]           # (1, D/2) even idx
    sin_part = jnp.sin(pos / jnp.power(10000.0, 2.0 * i / d_model))          # -> pe[:, i]
    cos_part = jnp.cos(pos / jnp.power(10000.0, 2.0 * (i + 1.0) / d_model))  # -> pe[:, i+1]
    pe = jnp.stack([sin_part, cos_part], axis=-1).reshape(max_seq_len, d_model)
    return pe.astype(jnp.float32)


def posenc_kernel(x_ref, pe_ref, out_ref, *, scale):
    # x_ref:  (TB, S*D)   f32 block of TB batch rows (flattened seq*dim, lane-dense)
    # pe_ref: (1,  S*D)   f32, broadcast across the TB batch rows
    out_ref[...] = x_ref[...] * scale + pe_ref[...]


def _pick_batch_tile(B, row_bytes, budget_bytes=4 << 20):
    """Largest divisor of B whose block fits the VMEM budget.

    Prefer tiles that keep the sublane (second-to-last) block dim (8,128)-friendly:
    either the full batch extent or a multiple of 8.
    """
    fit = max(1, budget_bytes // max(row_bytes, 1))
    if fit >= B:
        return B
    best = 1
    for d in range(1, B + 1):
        if B % d == 0 and d <= fit and (d == B or d % 8 == 0):
            best = max(best, d)
    if best == 1:  # fall back to any fitting divisor
        for d in range(1, B + 1):
            if B % d == 0 and d <= fit:
                best = max(best, d)
    return best


def positional_encoder_forward(x, pe_table):
    """x: (B, S, D) f32, pe_table: (max_seq_len, D) f32. Returns (B, S, D) f32."""
    B, S, D = x.shape
    scale = math.sqrt(D)

    # Flatten (S, D) into one lane-dense row per batch element.
    xf = x.reshape(B, S * D)
    pef = pe_table[:S].reshape(1, S * D)

    tb = _pick_batch_tile(B, row_bytes=S * D * 4)
    grid = (B // tb,)

    kernel = functools.partial(posenc_kernel, scale=scale)

    out = pl.pallas_call(
        kernel,
        out_shape=jax.ShapeDtypeStruct((B, S * D), jnp.float32),
        grid=grid,
        in_specs=[
            pl.BlockSpec((tb, S * D), lambda b: (b, 0)),   # x rows
            pl.BlockSpec((1, S * D), lambda b: (0, 0)),    # shared PE row
        ],
        out_specs=pl.BlockSpec((tb, S * D), lambda b: (b, 0)),
        compiler_params=pltpu.CompilerParams(
            dimension_semantics=("parallel",),
        ),
    )(xf, pef)

    return out.reshape(B, S, D)


def positional_encoder_reference(x, pe_table):
    """Pure-JAX reference mirroring the PyTorch forward (eval mode)."""
    B, S, D = x.shape
    return x * math.sqrt(D) + pe_table[:S][None, :, :]


if __name__ == "__main__":
    B, S, D, MAX_LEN = 2, 8, 32, 512

    key = jax.random.PRNGKey(0)
    x = jax.random.normal(key, (B, S, D), jnp.float32)

    pe_table = make_positional_encoding(MAX_LEN, D)

    out = positional_encoder_forward(x, pe_table)
    out = jax.block_until_ready(out)

    ref = positional_encoder_reference(x, pe_table)
    assert out.shape == (B, S, D)
    assert jnp.allclose(out, ref, atol=1e-5, rtol=1e-5), (
        f"max abs err {jnp.max(jnp.abs(out - ref))}"
    )

    print("KERNEL_OK")
</pallas_src>

<mosaic_0001>
module attributes {stable_mosaic.version = 11 : i64} {
  func.func @posenc_kernel(%arg0: i32, %arg1: memref<2x256xf32, #tpu.memory_space<vmem>>, %arg2: memref<1x256xf32, #tpu.memory_space<vmem>>, %arg3: memref<2x256xf32, #tpu.memory_space<vmem>>) attributes {dimension_semantics = [#tpu.dimension_semantics<parallel>], iteration_bounds = array<i64: 1>, scalar_prefetch = 0 : i64, scratch_operands = 0 : i64, tpu.core_type = #tpu.core_type<tc>, window_params = [{transform_indices = @transform_0, window_bounds = array<i64: 2, 256>}, {pipeline_mode = #tpu.pipeline_mode<synchronous>, transform_indices = @transform_1, window_bounds = array<i64: 1, 256>}, {transform_indices = @transform_2, window_bounds = array<i64: 2, 256>}]} {
    %c0 = arith.constant 0 : index
    %c0_0 = arith.constant 0 : index
    %0 = vector.load %arg1[%c0, %c0_0] : memref<2x256xf32, #tpu.memory_space<vmem>>, vector<2x256xf32>
    %cst = arith.constant 5.65685415 : f32
    %1 = vector.broadcast %cst : f32 to vector<2x256xf32>
    %2 = arith.mulf %0, %1 : vector<2x256xf32>
    %c0_1 = arith.constant 0 : index
    %c0_2 = arith.constant 0 : index
    %3 = vector.load %arg2[%c0_1, %c0_2] : memref<1x256xf32, #tpu.memory_space<vmem>>, vector<1x256xf32>
    %4 = vector.broadcast %3 : vector<1x256xf32> to vector<2x256xf32>
    %5 = arith.addf %2, %4 : vector<2x256xf32>
    %c0_3 = arith.constant 0 : index
    %c0_4 = arith.constant 0 : index
    %6 = vector.load %arg3[%c0_3, %c0_4] : memref<2x256xf32, #tpu.memory_space<vmem>>, vector<2x256xf32>
    tpu.vector_store %arg3[%c0_3, %c0_4], %5 {strides = array<i32>} : memref<2x256xf32, #tpu.memory_space<vmem>>, vector<2x256xf32>,
    return
  }
  func.func @transform_0(%arg0: i32) -> (i32, i32) {
    %c0_i32 = arith.constant 0 : i32
    %c0_i32_0 = arith.constant 0 : i32
    return %arg0, %c0_i32 : i32, i32
  }
  func.func @transform_1(%arg0: i32) -> (i32, i32) {
    %c0_i32 = arith.constant 0 : i32
    %c0_i32_0 = arith.constant 0 : i32
    %c0_i32_1 = arith.constant 0 : i32
    return %c0_i32, %c0_i32_0 : i32, i32
  }
  func.func @transform_2(%arg0: i32) -> (i32, i32) {
    %c0_i32 = arith.constant 0 : i32
    %c0_i32_0 = arith.constant 0 : i32
    return %arg0, %c0_i32 : i32, i32
  }
}

</mosaic_0001>

<bundles_post_ra>
// kernel: tpu_custom_call.1
= control target key start
LH: loop header
LB: loop body
LE: loop exit
PB: predicated region body
PF: predicated region fallthrough
CT: control target
= control target key end

     0   :  { %7 = vsyncpa [#allocation3], 0  ;;  %s158_s0 = inlined_call_operand.hbm [shape: f32[2,256], index: 0, kind: input, shape index: {}]   ;;  %s159_s1 = inlined_call_operand.vmem [shape: f32[1,256], index: 1, kind: input, shape index: {}]   ;;  %s160_s2 = inlined_call_operand.hbm [shape: f32[2,256], index: 2, kind: output, shape index: {}]  }
   0x1   :  { %8 = vsyncpa [#allocation4], 0  ;;  %s113_s9 = smov [#allocation2]   ;;  %s65_s13 = scalar_lea.hbm %s158_s0, 64 }
   0x2   :  { %s15_s10 = sshll.u32 %s113_s9, 4  ;;  %p66_p0 = scmp.ne.s32.totalorder %s158_s0, %s65_s13  ;;  %s16_s10 = int_to_ptr.vmem [resolvable:$true] %s15_s10 }
   0x3   :  { %p69_p1 = scmp.lt.u32.totalorder %s65_s13, %s158_s0 }
   0x5   :  { %p71_p2 = pnand %p69_p1, %p66_p0 }
   0x7   :  { %74 = shalt.err (!%p71_p2)
}
   0x8   :  { %s75_s18 = scalar_lea.vmem %s16_s10, 64  ;;  %p80_p4 = scmp.lt.s32.totalorder %s16_s10, %s16_s10 }
   0x9   :  { %p76_p3 = scmp.ne.s32.totalorder %s16_s10, %s75_s18  ;;  %p81_p5 = scmp.lt.s32.totalorder %s75_s18, %s75_s18 }
   0xb   :  { %p82_p6 = por %p81_p5, %p80_p4 }
   0xd   :  { %p83_p7 = pnand %p82_p6, %p76_p3 }
   0xf   :  { %86 = shalt.err (!%p83_p7)
}
  0x10   :  { %18 = dma.hbm_to_vmem [thread:$0]  %s158_s0, 64, %s16_s10, [#allocation3]  }
  0x11   :  { %109 = dma.done.wait [#allocation3], 64  }
  0x12   :  { %110 = vsyncadd [#allocation3], 4294967232  ;;  %v28_v0 = vlaneseq  ;;  %v114_v1 = vmov 1983009808   ;;  %v24_v7 = vld [vmem:[#allocation2] sm:$0xf] }
  0x13   :  { %v38_v2 = vunpack.c.l.s4 %v114_v1  ;;  %v26_v8 = vld [vmem:[%s159_s1] sm:$0x3]  ;;  %v25_v12 = vmul.f32 5.656854, %v24_v7  ;;  %s115_s0 = smov [#allocation5]  }
  0x14   :  { %v29_v3 = vshrl.u32 %v28_v0, 7  ;;  %s53_s23 = sshll.u32 %s115_s0, 4  ;;  %s54_s23 = int_to_ptr.vmem [resolvable:$true] %s53_s23 }
  0x15   :  { %v39_v6 = vunpack.c.0.s8 %v38_v2  ;;  %s87_s24 = scalar_lea.vmem %s54_s23, 64  ;;  %p92_p9 = scmp.lt.s32.totalorder %s54_s23, %s54_s23 }
  0x16   :  { %v30_v4 = vsub.s32 0, %v29_v3  ;;  %v34_v5 = vsub.s32 1, %v29_v3  ;;  %p88_p8 = scmp.ne.s32.totalorder %s54_s23, %s87_s24  ;;  %p93_p10 = scmp.lt.s32.totalorder %s87_s24, %s87_s24 }
  0x17   :  { %v42_v11 = vsub.s32 %v39_v6, %v29_v3 }
  0x18   :  { %v31_v9 = vrot.slane %v26_v8, %v30_v4  ;;  %v35_v10 = vrot.slane %v26_v8, %v34_v5  ;;  %p94_p11 = por %p93_p10, %p92_p9 }
  0x1a   :  { %v36_v13 = vcombine.low %v31_v9, %v35_v10  ;;  %p95_p12 = pnand %p94_p11, %p88_p8 }
  0x1c   :  { %v43_v14 = vrot.slane %v36_v13, %v42_v11 }
  0x1e   :  { %v45_v15 = vadd.f32 %v43_v14, %v25_v12 }
  0x20   :  { %46 = vst [vmem:[#allocation5] sm:$0xf] %v45_v15 }
  0x21   :  { %98 = shalt.err (!%p95_p12)
}
  0x22   :  { %s99_s26 = scalar_lea.hbm %s160_s2, 64 }
  0x23   :  { %p100_p13 = scmp.ne.s32.totalorder %s160_s2, %s99_s26  ;;  %p103_p0 = scmp.lt.u32.totalorder %s99_s26, %s160_s2 }
  0x25   :  { %p105_p1 = pnand %p103_p0, %p100_p13 }
  0x27   :  { %108 = shalt.err (!%p105_p1)
}
  0x28   :  { %56 = dma.vmem_to_hbm [thread:$0]  %s54_s23, 64, %s160_s2, [#allocation4]  }
  0x29   :  { %111 = dma.done.wait [#allocation4], 64  }
  0x2a   :  { %112 = vsyncadd [#allocation4], 4294967232 }
  0x2b   :  { %60 = vsyncpa [#allocation3], 1 }
  0x2c   :  { %61 = vsyncpa [#allocation4], 1 }

</bundles_post_ra>
